<compile_context>
chip_gen: v7x
topology: tpu7x:2x2x1
jax: 0.10.0
libtpu: 0.0.40
codegen_flags: <defaults>
</compile_context>

<pallas_src>
import numpy as np
import jax
import jax.numpy as jnp
from jax.experimental import pallas as pl
from jax.experimental.pallas import tpu as pltpu


def _nearest_src_index(out_size: int, in_size: int) -> np.ndarray:
    # PyTorch mode='nearest': src = floor(dst * in_size / out_size), exact integer arithmetic.
    src = (np.arange(out_size, dtype=np.int64) * in_size) // out_size
    return np.clip(src, 0, in_size - 1)


def _combined_selection_matrix(h: int, w: int, size: int) -> np.ndarray:
    # One-hot (H*W, size*size) matrix: column `dst` selects flat source pixel src_flat[dst].
    ri = _nearest_src_index(size, h)
    ci = _nearest_src_index(size, w)
    src_flat = (ri[:, None] * w + ci[None, :]).reshape(-1)        # (size*size,)
    s = np.zeros((h * w, size * size), dtype=np.float32)
    s[src_flat, np.arange(size * size)] = 1.0
    return s


def _sublane(itemsize: int) -> int:
    # Sublane packing: 8 for 4-byte, 16 for 2-byte, 32 for 1-byte dtypes.
    return max(8, 32 // int(itemsize))


def _padded_block_bytes(rows: int, cols: int, itemsize: int) -> int:
    # Real VMEM footprint of a (rows, cols) block after (sublane, 128) tiling.
    sub = _sublane(itemsize)
    prow = -(-int(rows) // sub) * sub
    pcol = -(-int(cols) // 128) * 128
    return prow * pcol * int(itemsize)


def _vmem_capacity_bytes() -> int:
    try:
        return int(pltpu.get_tpu_info().vmem_capacity_bytes)
    except Exception:
        return 64 * 1024 * 1024  # conservative fallback (v7x per-TensorCore)


def _choose_tile_bc(bc: int, hw: int, oo: int,
                    io_itemsize: int, sel_itemsize: int, budget: int) -> int:
    sub = _sublane(io_itemsize)
    # Resident (non-pipelined) selection matrix, padded.
    fixed = _padded_block_bytes(hw, oo, sel_itemsize)
    # Per-BC-row cost with lane padding: double-buffered input + output blocks,
    # one f32 GEMM accumulator row, and (for integer inputs) an f32 cast copy of x.
    pcol_in = -(-hw // 128) * 128
    pcol_out = -(-oo // 128) * 128
    per_bc = (2 * pcol_in * io_itemsize          # double-buffered input block
              + 2 * pcol_out * io_itemsize       # double-buffered output block
              + pcol_out * 4)                    # f32 GEMM accumulator
    if sel_itemsize != io_itemsize:              # integer input: kernel keeps an f32 copy
        per_bc += pcol_in * 4
    tile = max(1, (budget - fixed) // per_bc)
    tile = int(min(tile, bc))
    # Give big problems >= 2 (ideally 8+) grid steps so the auto pipeline has work to overlap
    # and the "parallel" axis can actually be split across v7x's 2 TensorCores.
    if bc >= 8 * 64:
        tile = min(tile, pl.cdiv(bc, 8))
    elif bc >= 2 * sub:
        tile = min(tile, pl.cdiv(bc, 2))
    # Keep tiles sublane-aligned so blocks are never re-laid out.
    if tile >= sub:
        tile -= tile % sub
    return max(1, int(tile))


def _interp_kernel(x_ref, sel_ref, o_ref):
    # x_ref:   (TILE_BC, H*W)        native dtype, lane-dense
    # sel_ref: (H*W, size*size)      one-hot combined selection (compute dtype), VMEM-resident
    # o_ref:   (TILE_BC, size*size)  lane-dense output
    sel = sel_ref[...]
    x = x_ref[...].astype(sel.dtype)      # no-op for float inputs
    out = jnp.dot(x, sel, preferred_element_type=jnp.float32)
    o_ref[...] = out.astype(o_ref.dtype)  # exact: each output has exactly one source term


def f_interpolate(x: jax.Array, size: int) -> jax.Array:
    """Equivalent of F.interpolate(x, (size, size)) with default mode='nearest'.

    x: (N, C, H, W)  ->  (N, C, size, size)
    """
    n, c, h, w = x.shape
    bc = n * c
    hw = h * w
    oo = size * size

    x_flat = x.reshape(bc, hw)  # lane-dense input view

    compute_dtype = x.dtype if jnp.issubdtype(x.dtype, jnp.floating) else jnp.float32
    sel = jnp.asarray(_combined_selection_matrix(h, w, size), dtype=compute_dtype)

    io_isz = jnp.dtype(x.dtype).itemsize
    sel_isz = jnp.dtype(compute_dtype).itemsize

    vmem_cap = _vmem_capacity_bytes()
    budget = vmem_cap // 4                 # ~16 MiB on v7x, ~32 MiB on v5e/v6e
    tile_bc = _choose_tile_bc(bc, hw, oo, io_isz, sel_isz, budget)
    grid = (pl.cdiv(bc, tile_bc),)

    # Actual padded footprint of the chosen tiling -> scoped VMEM limit with headroom.
    footprint = (_padded_block_bytes(hw, oo, sel_isz)
                 + 2 * _padded_block_bytes(tile_bc, hw, io_isz)
                 + 2 * _padded_block_bytes(tile_bc, oo, io_isz)
                 + _padded_block_bytes(tile_bc, oo, 4)
                 + (_padded_block_bytes(tile_bc, hw, 4) if sel_isz != io_isz else 0))
    vmem_limit = int(min(vmem_cap * 3 // 4,
                         max(32 * 1024 * 1024, footprint + 8 * 1024 * 1024)))

    bytes_accessed = bc * hw * io_isz + bc * oo * io_isz + hw * oo * sel_isz
    flops = 2 * bc * hw * oo

    out_flat = pl.pallas_call(
        _interp_kernel,
        out_shape=jax.ShapeDtypeStruct((bc, oo), x.dtype),
        grid_spec=pltpu.PrefetchScalarGridSpec(
            num_scalar_prefetch=0,
            grid=grid,
            in_specs=[
                pl.BlockSpec((tile_bc, hw), lambda i: (i, 0)),
                pl.BlockSpec((hw, oo), lambda i: (0, 0)),   # VMEM-resident selection matrix
            ],
            out_specs=pl.BlockSpec((tile_bc, oo), lambda i: (i, 0)),
        ),
        compiler_params=pltpu.CompilerParams(
            dimension_semantics=("parallel",),   # shard BC tiles across v7x's 2 TCs
            vmem_limit_bytes=vmem_limit,
        ),
        cost_estimate=pl.CostEstimate(
            flops=flops, transcendentals=0, bytes_accessed=bytes_accessed),
    )(x_flat, sel)

    return out_flat.reshape(n, c, size, size)


if __name__ == "__main__":
    key = jax.random.PRNGKey(0)
    N, C, H, W = 2, 4, 16, 16
    SIZE = 8  # F_interpolate(size=8)

    x = jax.random.normal(key, (N, C, H, W), dtype=jnp.float32)

    out = f_interpolate(x, SIZE)
    out = jax.block_until_ready(out)

    # Reference check (pure JAX nearest-neighbor, same integer index rule as PyTorch).
    row_idx = _nearest_src_index(SIZE, H)
    col_idx = _nearest_src_index(SIZE, W)
    ref = x[:, :, row_idx, :][:, :, :, col_idx]

    assert out.shape == (N, C, SIZE, SIZE), out.shape
    assert jnp.allclose(out, ref, atol=1e-6, rtol=1e-6), "mismatch vs nearest-neighbor reference"

    print("KERNEL_OK")
</pallas_src>

<mosaic_0001>
module attributes {stable_mosaic.version = 11 : i64} {
  func.func @_interp_kernel(%arg0: i32, %arg1: memref<8x256xf32, #tpu.memory_space<vmem>>, %arg2: memref<256x64xf32, #tpu.memory_space<vmem>>, %arg3: memref<8x64xf32, #tpu.memory_space<vmem>>) attributes {dimension_semantics = [#tpu.dimension_semantics<parallel>], iteration_bounds = array<i64: 1>, scalar_prefetch = 0 : i64, scratch_operands = 0 : i64, tpu.core_type = #tpu.core_type<tc>, window_params = [{transform_indices = @transform_0, window_bounds = array<i64: 8, 256>}, {pipeline_mode = #tpu.pipeline_mode<synchronous>, transform_indices = @transform_1, window_bounds = array<i64: 256, 64>}, {transform_indices = @transform_2, window_bounds = array<i64: 8, 64>}]} {
    %c0 = arith.constant 0 : index
    %c0_0 = arith.constant 0 : index
    %0 = vector.load %arg2[%c0, %c0_0] : memref<256x64xf32, #tpu.memory_space<vmem>>, vector<256x64xf32>
    %c0_1 = arith.constant 0 : index
    %c0_2 = arith.constant 0 : index
    %1 = vector.load %arg1[%c0_1, %c0_2] : memref<8x256xf32, #tpu.memory_space<vmem>>, vector<8x256xf32>
    %cst = arith.constant dense<0.000000e+00> : vector<8x64xf32>
    %2 = tpu.matmul %1, %0, %cst {dimension_numbers = #tpu.dot_dimension_numbers<[1], [0], [0], [1], [0, 0, 1, 1], [], []>} : vector<8x256xf32>, vector<256x64xf32>, vector<8x64xf32> -> vector<8x64xf32>
    %c0_3 = arith.constant 0 : index
    %c0_4 = arith.constant 0 : index
    %3 = vector.load %arg3[%c0_3, %c0_4] : memref<8x64xf32, #tpu.memory_space<vmem>>, vector<8x64xf32>
    tpu.vector_store %arg3[%c0_3, %c0_4], %2 {strides = array<i32>} : memref<8x64xf32, #tpu.memory_space<vmem>>, vector<8x64xf32>,
    return
  }
  func.func @transform_0(%arg0: i32) -> (i32, i32) {
    %c0_i32 = arith.constant 0 : i32
    %c0_i32_0 = arith.constant 0 : i32
    return %arg0, %c0_i32 : i32, i32
  }
  func.func @transform_1(%arg0: i32) -> (i32, i32) {
    %c0_i32 = arith.constant 0 : i32
    %c0_i32_0 = arith.constant 0 : i32
    %c0_i32_1 = arith.constant 0 : i32
    return %c0_i32, %c0_i32_0 : i32, i32
  }
  func.func @transform_2(%arg0: i32) -> (i32, i32) {
    %c0_i32 = arith.constant 0 : i32
    %c0_i32_0 = arith.constant 0 : i32
    return %arg0, %c0_i32 : i32, i32
  }
}

</mosaic_0001>

<bundles_post_ra>
// kernel: tpu_custom_call.1
= control target key start
LH: loop header
LB: loop body
LE: loop exit
PB: predicated region body
PF: predicated region fallthrough
CT: control target
= control target key end

     0   :  { %s354_s0 = inlined_call_operand.vmem [shape: f32[8,256], index: 0, kind: input, shape index: {}]   ;;  %s355_s1 = inlined_call_operand.vmem [shape: f32[256,64], index: 1, kind: input, shape index: {}]   ;;  %s356_s2 = inlined_call_operand.hbm [shape: f32[8,64], index: 2, kind: output, shape index: {}]  }
   0x1   :  { %v28_v0 = vld [vmem:[%s355_s1 + $0x80] sm:$0xff]  ;;  %v29_v1 = vld [vmem:[%s355_s1 + $0x88] sm:$0xff]  ;;  %v30_v5 = vld [vmem:[%s355_s1 + $0x90] sm:$0xff] }
   0x2   :  { %v12_v2 = vld [vmem:[%s355_s1] sm:$0xff]  ;;  %v167_v3 = vpack.c.bf16 %v29_v1, %v28_v0  ;;  %v13_v4 = vld [vmem:[%s355_s1 + $0x8] sm:$0xff]  ;;  %v31_v6 = vld [vmem:[%s355_s1 + $0x98] sm:$0xff] }
   0x3   :  { %v169_v7 = vpack.c.bf16 %v13_v4, %v12_v2  ;;  %v171_v8 = vpack.c.bf16 %v31_v6, %v30_v5  ;;  %v14_v9 = vld [vmem:[%s355_s1 + $0x10] sm:$0xff]  ;;  %v15_v10 = vld [vmem:[%s355_s1 + $0x18] sm:$0xff]  ;;  %v32_v11 = vld [vmem:[%s355_s1 + $0xa0] sm:$0xff] }
   0x4   :  { %168 = vmatprep.subr.bf16.mxu0 %v167_v3  ;;  %v33_v12 = vld [vmem:[%s355_s1 + $0xa8] sm:$0xff]  ;;  %v173_v13 = vpack.c.bf16 %v15_v10, %v14_v9  ;;  %v16_v15 = vld [vmem:[%s355_s1 + $0x20] sm:$0xff]  ;;  %v34_v17 = vld [vmem:[%s355_s1 + $0xb0] sm:$0xff] }
   0x5   :  { %170 = vmatpush3.bf16.msra.mxu0 %v169_v7  ;;  %v175_v14 = vpack.c.bf16 %v33_v12, %v32_v11  ;;  %v17_v16 = vld [vmem:[%s355_s1 + $0x28] sm:$0xff]  ;;  %v35_v18 = vld [vmem:[%s355_s1 + $0xb8] sm:$0xff]  ;;  %v18_v21 = vld [vmem:[%s355_s1 + $0x30] sm:$0xff] }
   0x6   :  { %172 = vmatprep.subr.bf16.mxu0 %v171_v8  ;;  %v177_v19 = vpack.c.bf16 %v17_v16, %v16_v15  ;;  %v179_v20 = vpack.c.bf16 %v35_v18, %v34_v17  ;;  %v19_v22 = vld [vmem:[%s355_s1 + $0x38] sm:$0xff]  ;;  %v36_v23 = vld [vmem:[%s355_s1 + $0xc0] sm:$0xff]  ;;  %v37_v24 = vld [vmem:[%s355_s1 + $0xc8] sm:$0xff] }
   0x7   :  { %v45_v25 = vld [vmem:[%s354_s0 + $0x8] sm:$0xff] }
   0x8   :  { %110 = vmatprep.mubr.f32.mxu0 %v45_v25 }
   0x9   :  { %174 = vmatpush3.bf16.msra.mxu0 %v173_v13 }
   0xa   :  { %176 = vmatprep.subr.bf16.mxu0 %v175_v14 }
   0xb   :  { %7 = vsyncpa [#allocation3], 0  ;;  %v181_v26 = vpack.c.bf16 %v19_v22, %v18_v21  ;;  %v183_v27 = vpack.c.bf16 %v37_v24, %v36_v23  ;;  %v20_v28 = vld [vmem:[%s355_s1 + $0x40] sm:$0xff]  ;;  %v21_v29 = vld [vmem:[%s355_s1 + $0x48] sm:$0xff]  ;;  %s224_s21 = smov [#allocation2]   ;;  %vm116_vm0 = vcmask 523264  }
   0xc   :  { %v38_v30 = vld [vmem:[%s355_s1 + $0xd0] sm:$0xff]  ;;  %v39_v31 = vld [vmem:[%s355_s1 + $0xd8] sm:$0xff]  ;;  %v185_v32 = vpack.c.bf16 %v21_v29, %v20_v28  ;;  %v40_v36 = vld [vmem:[%s355_s1 + $0xe0] sm:$0xff]  ;;  %s124_s22 = sshll.u32 %s224_s21, 4  ;;  %s125_s22 = int_to_ptr.vmem [resolvable:$true] %s124_s22 }
   0xd   :  { %178 = vmatpush3.bf16.msra.mxu0 %v177_v19  ;;  %v187_v33 = vpack.c.bf16 %v39_v31, %v38_v30  ;;  %v22_v34 = vld [vmem:[%s355_s1 + $0x50] sm:$0xff]  ;;  %v23_v35 = vld [vmem:[%s355_s1 + $0x58] sm:$0xff]  ;;  %v41_v37 = vld [vmem:[%s355_s1 + $0xe8] sm:$0xff]  ;;  %s200_s23 = scalar_lea.vmem %s125_s22, 128  ;;  %p205_p1 = scmp.lt.s32.totalorder %s125_s22, %s125_s22 }
   0xe   :  { %180 = vmatprep.subr.bf16.mxu0 %v179_v20  ;;  %v189_v38 = vpack.c.bf16 %v23_v35, %v22_v34  ;;  %v191_v39 = vpack.c.bf16 %v41_v37, %v40_v36  ;;  %v24_v40 = vld [vmem:[%s355_s1 + $0x60] sm:$0xff]  ;;  %v25_v41 = vld [vmem:[%s355_s1 + $0x68] sm:$0xff]  ;;  %v42_v42 = vld [vmem:[%s355_s1 + $0xf0] sm:$0xff]  ;;  %p201_p0 = scmp.ne.s32.totalorder %s125_s22, %s200_s23  ;;  %p206_p2 = scmp.lt.s32.totalorder %s200_s23, %s200_s23 }
   0xf   :  { %v43_v43 = vld [vmem:[%s355_s1 + $0xf8] sm:$0xff]  ;;  %v193_v44 = vpack.c.bf16 %v25_v41, %v24_v40  ;;  %v26_v46 = vld [vmem:[%s355_s1 + $0x70] sm:$0xff]  ;;  %v44_v49 = vld [vmem:[%s354_s0] sm:$0xff] }
  0x10   :  { %v195_v45 = vpack.c.bf16 %v43_v43, %v42_v42  ;;  %v27_v47 = vld [vmem:[%s355_s1 + $0x78] sm:$0xff]  ;;  %p207_p3 = por %p206_p2, %p205_p1 }
  0x11   :  { %182 = vmatpush3.bf16.msra.mxu0 %v181_v26  ;;  %v197_v48 = vpack.c.bf16 %v27_v47, %v26_v46 }
  0x12   :  { %184 = vmatprep.subr.bf16.mxu0 %v183_v27  ;;  %p208_p4 = pnand %p207_p3, %p201_p0 }
  0x15   :  { %186 = vmatpush3.bf16.msra.mxu0 %v185_v32 }
  0x16   :  { %188 = vmatprep.subr.bf16.mxu0 %v187_v33 }
  0x19   :  { %190 = vmatpush3.bf16.msra.mxu0 %v189_v38 }
  0x1a   :  { %192 = vmatprep.subr.bf16.mxu0 %v191_v39 }
  0x1d   :  { %194 = vmatpush3.bf16.msra.mxu0 %v193_v44 }
  0x1e   :  { %196 = vmatprep.subr.bf16.mxu0 %v195_v45 }
  0x21   :  { %198 = vmatpush3.bf16.msra.mxu0 %v197_v48 }
  0x24   :  { %111 = vmatmul.mubr.f32.vlgmr.msra.gmra.mrb[0].mxu0 %v44_v49 }
  0xf7   :  { %v164_v50 = vpop.f32.mrb[0].mxu0 }
  0xf8   :  { %v165_v51 = vpop.f32.mrb[1].mxu0 }
  0xf9   :  { %v166_v52 = vadd.f32 %v165_v51, %v164_v50 }
  0xfb   :  { %117 = vst.msk [vmem:[#allocation2] sm:$0xff] %vm116_vm0, %v166_v52 }
  0xfc   :  { %211 = shalt.err (!%p208_p4)
}
  0xfd   :  { %s212_s0 = scalar_lea.hbm %s356_s2, 128 }
  0xfe   :  { %p213_p5 = scmp.ne.s32.totalorder %s356_s2, %s212_s0  ;;  %p216_p6 = scmp.lt.u32.totalorder %s212_s0, %s356_s2 }
 0x100   :  { %p218_p7 = pnand %p216_p6, %p213_p5 }
 0x102   :  { %221 = shalt.err (!%p218_p7)
}
 0x103   :  { %127 = dma.vmem_to_hbm [thread:$0]  %s125_s22, 128, %s356_s2, [#allocation3]  }
 0x104   :  { %222 = dma.done.wait [#allocation3], 128  }
 0x105   :  { %223 = vsyncadd [#allocation3], 4294967168 }
 0x106   :  { %131 = vsyncpa [#allocation3], 1 }

</bundles_post_ra>
